<compile_context>
chip_gen: v7x
topology: tpu7x:2x2x1
jax: 0.10.0
libtpu: 0.0.40
codegen_flags: <defaults>
</compile_context>

<pallas_src>
import functools

import jax
import jax.numpy as jnp
import numpy as np
from jax.experimental import pallas as pl
from jax.experimental.pallas import tpu as pltpu


def _vmem_capacity_bytes():
    try:
        return int(pltpu.get_tpu_info().vmem_capacity_bytes)
    except Exception:
        return 64 << 20  # conservative (v7x-sized) fallback


def _pick_c_tile(C, S, R, H, W, compute_elem_bytes, vmem_cap):
    """Largest channel tile (128-aligned divisor of C, or C) fitting the budget."""
    budget = int(vmem_cap * 0.55)               # leave headroom for temporaries
    # resident: double-buffered Eh/Ew (f32) + B / wy_S / wx_S f32 temporaries
    fixed = 2 * (H + W) * S * 4 + 4 * R * S * 4
    avail = max(budget - fixed, 0)

    def need(ct):  # double-buffered feature block + double-buffered output block
        return 2 * S * ct * compute_elem_bytes + 2 * R * ct * 4

    cands = sorted({C} | {ct for ct in range(128, C, 128) if C % ct == 0},
                   reverse=True)
    for ct in cands:
        if need(ct) <= avail:
            return ct
    # TODO(synk): nothing aligned fits the budget (huge maps); fall back to the
    # smallest legal tile and rely on the clamped vmem limit.  The real fix is
    # the RoI-row-cropped DMA, which shrinks S itself.
    return cands[-1]


def _roi_align_kernel(bidx_ref, coords_ref, eh_ref, ew_ref, feat_ref, out_ref,
                      *, spatial_scale, PH, PW, GH, GW, H, W, compute_dtype):
    del bidx_ref  # consumed by the feature-map index_map only
    k = pl.program_id(1)
    R = PH * PW

    # --- per-RoI scalars (SMEM) ------------------------------------------
    y1 = coords_ref[4 * k + 0] * spatial_scale
    x1 = coords_ref[4 * k + 1] * spatial_scale
    y2 = coords_ref[4 * k + 2] * spatial_scale
    x2 = coords_ref[4 * k + 3] * spatial_scale
    roi_h = jnp.maximum(y2 - y1, 1.0)
    roi_w = jnp.maximum(x2 - x1, 1.0)
    dy = roi_h / (PH * GH)  # spacing between sample rows
    dx = roi_w / (PW * GW)  # spacing between sample cols

    # --- in-kernel index tables (iota; no lane-sparse table DMAs) ---------
    r_idx = jax.lax.broadcasted_iota(jnp.int32, (R, 1), 0).astype(jnp.float32)
    pf = jnp.floor(r_idx / PW)            # output row   ph per flat r
    qf = r_idx - pf * PW                  # output col   pw per flat r
    hgrid = jax.lax.broadcasted_iota(jnp.int32, (1, H), 1).astype(jnp.float32)
    wgrid = jax.lax.broadcasted_iota(jnp.int32, (1, W), 1).astype(jnp.float32)

    # --- separable tent-weight build: wy (R, H), wx (R, W) ----------------
    # torchvision bilinear weight of sample coord y at grid row h:
    #     valid(y) * max(0, 1 - |clamp(y, 0, H-1) - h|)
    # Averaging over the GHxGW grid is separable, so accumulate the row and
    # column weight sums independently on small (R,H)/(R,W) arrays.
    wy = jnp.zeros((R, H), jnp.float32)
    for gy in range(GH):
        sy = y1 + (pf * GH + (gy + 0.5)) * dy                       # (R, 1)
        valid = ((sy >= -1.0) & (sy <= float(H))).astype(jnp.float32)
        syc = jnp.clip(sy, 0.0, float(H - 1))
        wy = wy + valid * jnp.maximum(0.0, 1.0 - jnp.abs(syc - hgrid))
    wx = jnp.zeros((R, W), jnp.float32)
    for gx in range(GW):
        sx = x1 + (qf * GW + (gx + 0.5)) * dx                       # (R, 1)
        valid = ((sx >= -1.0) & (sx <= float(W))).astype(jnp.float32)
        sxc = jnp.clip(sx, 0.0, float(W - 1))
        wx = wx + valid * jnp.maximum(0.0, 1.0 - jnp.abs(sxc - wgrid))

    # --- expand to the fused (R, S) bilinear+pool matrix B -----------------
    # Two tiny MXU matmuls against constant 0/1 expansion matrices (safe 2-D
    # dots; no in-kernel reshape), then one (R, S) VPU multiply.
    wy_s = jnp.dot(wy, eh_ref[...], preferred_element_type=jnp.float32)  # (R,S)
    wx_s = jnp.dot(wx, ew_ref[...], preferred_element_type=jnp.float32)  # (R,S)
    b = (wy_s * wx_s * (1.0 / (GH * GW))).astype(compute_dtype)

    # --- main lane-dense MXU matmul: (R, S) @ (S, Ct) -> (R, Ct) -----------
    out_ref[0] = jnp.dot(b, feat_ref[0],
                         preferred_element_type=jnp.float32).astype(out_ref.dtype)


def roi_align_2d_pallas(feat, rois, output_size, spatial_scale=1.0,
                        sampling_ratio=2, compute_dtype=jnp.bfloat16,
                        channels_last=False):
    """RoIAlign forward.

    feat: (N, C, H, W) (or (N, H, W, C) if channels_last=True)
    rois: (K, 5) rows of (batch_idx, y1, x1, y2, x2), un-scaled coordinates.
    Returns (K, C, PH, PW) float32.
    Note: out-of-range batch indices are clipped to [0, N-1] (documented
    deviation from torchvision, which has undefined behaviour there).
    """
    assert sampling_ratio > 0  # TODO(synk): adaptive sampling_ratio <= 0
    if channels_last:
        N, H, W, C = feat.shape
        feat_nhwc = feat
    else:
        N, C, H, W = feat.shape
        # TODO(synk): prefer channels_last=True upstream; this transpose is a
        # full extra HBM read+write of the feature map outside the kernel.
        feat_nhwc = jnp.transpose(feat, (0, 2, 3, 1))
    K = rois.shape[0]
    PH, PW = output_size
    GH = GW = int(sampling_ratio)
    R, S = PH * PW, H * W
    elem = jnp.dtype(compute_dtype).itemsize

    # Sort RoIs by (clipped) batch index so consecutive inner-grid steps hit
    # the same feature block and Pallas skips the re-DMA; un-permute after.
    batch_idx = jnp.clip(rois[:, 0].astype(jnp.int32), 0, N - 1)
    order = jnp.argsort(batch_idx)
    inv_order = jnp.argsort(order)
    batch_idx_s = batch_idx[order]
    coords_s = rois[order, 1:5].astype(jnp.float32).reshape(-1)  # flat 1-D SMEM

    # Channels-last, spatially flattened features: lane dim = C, compute dtype.
    feat_nlc = feat_nhwc.reshape(N, S, C).astype(compute_dtype)

    # Constant 0/1 expansion matrices: Eh[h, h'*W + w'] = [h == h'],
    # Ew[w, h'*W + w'] = [w == w'].  Kept f32 so the B build stays exact until
    # the final cast.  (Row-cropped DMA would shrink these with S.)
    eh = jnp.asarray(np.kron(np.eye(H, dtype=np.float32),
                             np.ones((1, W), np.float32)))      # (H, S)
    ew = jnp.asarray(np.kron(np.ones((1, H), np.float32),
                             np.eye(W, dtype=np.float32)))      # (W, S)

    vmem_cap = _vmem_capacity_bytes()
    c_tile = _pick_c_tile(C, S, R, H, W, elem, vmem_cap)
    num_c_tiles = C // c_tile

    kernel = functools.partial(
        _roi_align_kernel, spatial_scale=float(spatial_scale),
        PH=PH, PW=PW, GH=GH, GW=GW, H=H, W=W, compute_dtype=compute_dtype)

    # Grid: channel tiles outer, RoIs inner -> the feature block index only
    # changes when bidx[k] changes, so the sort-by-batch reuse fires even when
    # channel tiling is active.  B is rebuilt each step (cheap, separable).
    grid_spec = pltpu.PrefetchScalarGridSpec(
        num_scalar_prefetch=1,
        grid=(num_c_tiles, K),
        in_specs=[
            pl.BlockSpec(memory_space=pltpu.MemorySpace.SMEM),      # flat coords
            pl.BlockSpec((H, S), lambda c, k, bidx: (0, 0)),        # Eh (const)
            pl.BlockSpec((W, S), lambda c, k, bidx: (0, 0)),        # Ew (const)
            # TODO(synk): crop this DMA to the RoI's bounding rows (pl.ds on H
            # from the prefetched coords) for FPN-scale maps.
            pl.BlockSpec((1, S, c_tile), lambda c, k, bidx: (bidx[k], 0, c)),
        ],
        out_specs=pl.BlockSpec((1, R, c_tile), lambda c, k, bidx: (k, 0, c)),
    )

    # Generation-aware scoped-VMEM limit, clamped below physical capacity.
    est = (2 * (H + W) * S * 4          # Eh/Ew (double-buffered, f32)
           + 4 * R * S * 4              # B / wy_S / wx_S temporaries
           + 2 * S * c_tile * elem      # double-buffered feature block
           + 2 * R * c_tile * 4         # double-buffered output block
           + (1 << 20))
    vmem_limit = int(min(max(est, 32 << 20), int(vmem_cap * 0.9)))

    out_flat = pl.pallas_call(
        kernel,
        out_shape=jax.ShapeDtypeStruct((K, R, C), jnp.float32),
        grid_spec=grid_spec,
        compiler_params=pltpu.CompilerParams(
            dimension_semantics=("arbitrary", "parallel"),  # RoI axis -> megacore
            vmem_limit_bytes=vmem_limit),
    )(batch_idx_s, coords_s, eh, ew, feat_nlc)

    # TODO(synk): batch several same-image RoIs per grid step (fills the MXU
    # M dimension and amortizes the ~0.35 us per-step overhead for large K).

    # (K, PH*PW, C) -> (K, C, PH, PW), back in the original RoI order.
    out = out_flat.reshape(K, PH, PW, C).transpose(0, 3, 1, 2)
    return out[inv_order]


# ---------------- pure-numpy reference (torchvision roi_align semantics) -----
def _bilinear(img, y, x, H, W):
    if y < -1.0 or y > H or x < -1.0 or x > W:
        return np.zeros(img.shape[0], np.float64)
    y = max(y, 0.0)
    x = max(x, 0.0)
    y_low, x_low = int(y), int(x)
    if y_low >= H - 1:
        y_high = y_low = H - 1
        y = float(y_low)
    else:
        y_high = y_low + 1
    if x_low >= W - 1:
        x_high = x_low = W - 1
        x = float(x_low)
    else:
        x_high = x_low + 1
    ly, lx = y - y_low, x - x_low
    hy, hx = 1.0 - ly, 1.0 - lx
    return (
        hy * hx * img[:, y_low, x_low]
        + hy * lx * img[:, y_low, x_high]
        + ly * hx * img[:, y_high, x_low]
        + ly * lx * img[:, y_high, x_high]
    )


def roi_align_2d_ref(feat, rois, output_size, spatial_scale, sampling_ratio):
    feat = np.asarray(feat, np.float64)
    rois = np.asarray(rois, np.float64)
    N, C, H, W = feat.shape
    K = rois.shape[0]
    PH, PW = output_size
    out = np.zeros((K, C, PH, PW), np.float64)
    for k in range(K):
        b = int(rois[k, 0])
        y1, x1, y2, x2 = rois[k, 1:5] * spatial_scale
        roi_h = max(y2 - y1, 1.0)
        roi_w = max(x2 - x1, 1.0)
        bin_h, bin_w = roi_h / PH, roi_w / PW
        gh = sampling_ratio if sampling_ratio > 0 else int(np.ceil(roi_h / PH))
        gw = sampling_ratio if sampling_ratio > 0 else int(np.ceil(roi_w / PW))
        count = gh * gw
        for ph in range(PH):
            for pw in range(PW):
                acc = np.zeros(C, np.float64)
                for iy in range(gh):
                    y = y1 + ph * bin_h + (iy + 0.5) * bin_h / gh
                    for ix in range(gw):
                        x = x1 + pw * bin_w + (ix + 0.5) * bin_w / gw
                        acc += _bilinear(feat[b], y, x, H, W)
                out[k, :, ph, pw] = acc / count
    return out.astype(np.float32)


if __name__ == "__main__":
    key = jax.random.PRNGKey(0)
    N, C, H, W = 2, 4, 16, 16
    output_size = (4, 4)
    spatial_scale = 0.5
    sampling_ratio = 2

    feat = jax.random.normal(key, (N, C, H, W), jnp.float32)
    # rois: (batch_idx, y1, x1, y2, x2) in un-scaled coordinates
    rois = jnp.array(
        [
            [0.0, 2.0, 3.0, 20.0, 24.0],
            [1.0, 0.0, 0.0, 31.0, 31.0],
            [0.0, 10.0, 6.0, 22.0, 30.0],
        ],
        dtype=jnp.float32,
    )

    ref = roi_align_2d_ref(
        np.asarray(feat), np.asarray(rois), output_size, spatial_scale,
        sampling_ratio)

    # Exact f32 path.
    out_f32 = jax.block_until_ready(roi_align_2d_pallas(
        feat, rois, output_size, spatial_scale=spatial_scale,
        sampling_ratio=sampling_ratio, compute_dtype=jnp.float32))
    np.testing.assert_allclose(np.asarray(out_f32), ref, rtol=1e-4, atol=1e-4)

    # Default bf16 compute path (feature tile + B in bf16, f32 accumulate).
    out_bf16 = jax.block_until_ready(roi_align_2d_pallas(
        feat, rois, output_size, spatial_scale=spatial_scale,
        sampling_ratio=sampling_ratio, compute_dtype=jnp.bfloat16))
    np.testing.assert_allclose(np.asarray(out_bf16), ref, rtol=3e-2, atol=3e-2)

    print("KERNEL_OK")
</pallas_src>

<mosaic_0001>
module attributes {stable_mosaic.version = 11 : i64} {
  func.func @_roi_align_kernel(%arg0: i32, %arg1: i32, %arg2: memref<3xi32, #tpu.memory_space<smem>>, %arg3: memref<12xf32, #tpu.memory_space<smem>>, %arg4: memref<16x256xf32, #tpu.memory_space<vmem>>, %arg5: memref<16x256xf32, #tpu.memory_space<vmem>>, %arg6: memref<1x256x4xf32, #tpu.memory_space<vmem>>, %arg7: memref<1x16x4xf32, #tpu.memory_space<vmem>>) attributes {dimension_semantics = [#tpu.dimension_semantics<arbitrary>, #tpu.dimension_semantics<parallel>], iteration_bounds = array<i64: 1, 3>, scalar_prefetch = 1 : i64, scratch_operands = 0 : i64, tpu.core_type = #tpu.core_type<tc>, window_params = [{transform_indices = @transform_0, window_bounds = array<i64: 12>}, {pipeline_mode = #tpu.pipeline_mode<synchronous>, transform_indices = @transform_1, window_bounds = array<i64: 16, 256>}, {pipeline_mode = #tpu.pipeline_mode<synchronous>, transform_indices = @transform_2, window_bounds = array<i64: 16, 256>}, {transform_indices = @transform_3, window_bounds = array<i64: 1, 256, 4>}, {transform_indices = @transform_4, window_bounds = array<i64: 1, 16, 4>}]} {
    %c4_i32 = arith.constant 4 : i32
    %0 = arith.muli %c4_i32, %arg1 : i32
    %c0_i32 = arith.constant 0 : i32
    %1 = arith.addi %0, %c0_i32 : i32
    %2 = arith.index_cast %1 : i32 to index
    %3 = memref.load %arg3[%2] : memref<12xf32, #tpu.memory_space<smem>>
    %cst = arith.constant 5.000000e-01 : f32
    %4 = arith.mulf %3, %cst : f32
    %c4_i32_0 = arith.constant 4 : i32
    %5 = arith.muli %c4_i32_0, %arg1 : i32
    %c1_i32 = arith.constant 1 : i32
    %6 = arith.addi %5, %c1_i32 : i32
    %7 = arith.index_cast %6 : i32 to index
    %8 = memref.load %arg3[%7] : memref<12xf32, #tpu.memory_space<smem>>
    %cst_1 = arith.constant 5.000000e-01 : f32
    %9 = arith.mulf %8, %cst_1 : f32
    %c4_i32_2 = arith.constant 4 : i32
    %10 = arith.muli %c4_i32_2, %arg1 : i32
    %c2_i32 = arith.constant 2 : i32
    %11 = arith.addi %10, %c2_i32 : i32
    %12 = arith.index_cast %11 : i32 to index
    %13 = memref.load %arg3[%12] : memref<12xf32, #tpu.memory_space<smem>>
    %cst_3 = arith.constant 5.000000e-01 : f32
    %14 = arith.mulf %13, %cst_3 : f32
    %c4_i32_4 = arith.constant 4 : i32
    %15 = arith.muli %c4_i32_4, %arg1 : i32
    %c3_i32 = arith.constant 3 : i32
    %16 = arith.addi %15, %c3_i32 : i32
    %17 = arith.index_cast %16 : i32 to index
    %18 = memref.load %arg3[%17] : memref<12xf32, #tpu.memory_space<smem>>
    %cst_5 = arith.constant 5.000000e-01 : f32
    %19 = arith.mulf %18, %cst_5 : f32
    %20 = arith.subf %14, %4 : f32
    %cst_6 = arith.constant 1.000000e+00 : f32
    %21 = arith.maximumf %20, %cst_6 : f32
    %22 = arith.subf %19, %9 : f32
    %cst_7 = arith.constant 1.000000e+00 : f32
    %23 = arith.maximumf %22, %cst_7 : f32
    %cst_8 = arith.constant 8.000000e+00 : f32
    %24 = arith.divf %21, %cst_8 : f32
    %cst_9 = arith.constant 8.000000e+00 : f32
    %25 = arith.divf %23, %cst_9 : f32
    %26 = tpu.iota {dimensions = array<i32: 0>} : vector<16x1xi32>
    %27 = arith.sitofp %26 : vector<16x1xi32> to vector<16x1xf32>
    %cst_10 = arith.constant 4.000000e+00 : f32
    %28 = vector.broadcast %cst_10 : f32 to vector<16x1xf32>
    %29 = arith.divf %27, %28 : vector<16x1xf32>
    %30 = math.floor %29 : vector<16x1xf32>
    %cst_11 = arith.constant 4.000000e+00 : f32
    %31 = vector.broadcast %cst_11 : f32 to vector<16x1xf32>
    %32 = arith.mulf %30, %31 : vector<16x1xf32>
    %33 = arith.subf %27, %32 : vector<16x1xf32>
    %34 = tpu.iota {dimensions = array<i32: 1>} : vector<1x16xi32>
    %35 = arith.sitofp %34 : vector<1x16xi32> to vector<1x16xf32>
    %36 = tpu.iota {dimensions = array<i32: 1>} : vector<1x16xi32>
    %37 = arith.sitofp %36 : vector<1x16xi32> to vector<1x16xf32>
    %cst_12 = arith.constant 0.000000e+00 : f32
    %38 = vector.broadcast %cst_12 : f32 to vector<16x16xf32>
    %cst_13 = arith.constant 2.000000e+00 : f32
    %39 = vector.broadcast %cst_13 : f32 to vector<16x1xf32>
    %40 = arith.mulf %30, %39 : vector<16x1xf32>
    %cst_14 = arith.constant 5.000000e-01 : f32
    %41 = vector.broadcast %cst_14 : f32 to vector<16x1xf32>
    %42 = arith.addf %40, %41 : vector<16x1xf32>
    %43 = vector.broadcast %24 : f32 to vector<16x1xf32>
    %44 = arith.mulf %42, %43 : vector<16x1xf32>
    %45 = vector.broadcast %4 : f32 to vector<16x1xf32>
    %46 = arith.addf %45, %44 : vector<16x1xf32>
    %cst_15 = arith.constant -1.000000e+00 : f32
    %47 = vector.broadcast %cst_15 : f32 to vector<16x1xf32>
    %48 = arith.cmpf oge, %46, %47 : vector<16x1xf32>
    %cst_16 = arith.constant 1.600000e+01 : f32
    %49 = vector.broadcast %cst_16 : f32 to vector<16x1xf32>
    %50 = arith.cmpf ole, %46, %49 : vector<16x1xf32>
    %51 = arith.andi %48, %50 : vector<16x1xi1>
    %52 = arith.extui %51 : vector<16x1xi1> to vector<16x1xi32>
    %53 = arith.sitofp %52 : vector<16x1xi32> to vector<16x1xf32>
    %cst_17 = arith.constant 0.000000e+00 : f32
    %cst_18 = arith.constant 1.500000e+01 : f32
    %54 = vector.broadcast %cst_17 : f32 to vector<16x1xf32>
    %55 = arith.maximumf %54, %46 : vector<16x1xf32>
    %56 = vector.broadcast %cst_18 : f32 to vector<16x1xf32>
    %57 = arith.minimumf %56, %55 : vector<16x1xf32>
    %58 = vector.broadcast %57 : vector<16x1xf32> to vector<16x16xf32>
    %59 = vector.broadcast %35 : vector<1x16xf32> to vector<16x16xf32>
    %60 = arith.subf %58, %59 : vector<16x16xf32>
    %61 = math.absf %60 : vector<16x16xf32>
    %cst_19 = arith.constant 1.000000e+00 : f32
    %62 = vector.broadcast %cst_19 : f32 to vector<16x16xf32>
    %63 = arith.subf %62, %61 : vector<16x16xf32>
    %cst_20 = arith.constant 0.000000e+00 : f32
    %64 = vector.broadcast %cst_20 : f32 to vector<16x16xf32>
    %65 = arith.maximumf %64, %63 : vector<16x16xf32>
    %66 = vector.broadcast %53 : vector<16x1xf32> to vector<16x16xf32>
    %67 = arith.mulf %66, %65 : vector<16x16xf32>
    %68 = arith.addf %38, %67 : vector<16x16xf32>
    %cst_21 = arith.constant 2.000000e+00 : f32
    %69 = vector.broadcast %cst_21 : f32 to vector<16x1xf32>
    %70 = arith.mulf %30, %69 : vector<16x1xf32>
    %cst_22 = arith.constant 1.500000e+00 : f32
    %71 = vector.broadcast %cst_22 : f32 to vector<16x1xf32>
    %72 = arith.addf %70, %71 : vector<16x1xf32>
    %73 = vector.broadcast %24 : f32 to vector<16x1xf32>
    %74 = arith.mulf %72, %73 : vector<16x1xf32>
    %75 = vector.broadcast %4 : f32 to vector<16x1xf32>
    %76 = arith.addf %75, %74 : vector<16x1xf32>
    %cst_23 = arith.constant -1.000000e+00 : f32
    %77 = vector.broadcast %cst_23 : f32 to vector<16x1xf32>
    %78 = arith.cmpf oge, %76, %77 : vector<16x1xf32>
    %cst_24 = arith.constant 1.600000e+01 : f32
    %79 = vector.broadcast %cst_24 : f32 to vector<16x1xf32>
    %80 = arith.cmpf ole, %76, %79 : vector<16x1xf32>
    %81 = arith.andi %78, %80 : vector<16x1xi1>
    %82 = arith.extui %81 : vector<16x1xi1> to vector<16x1xi32>
    %83 = arith.sitofp %82 : vector<16x1xi32> to vector<16x1xf32>
    %cst_25 = arith.constant 0.000000e+00 : f32
    %cst_26 = arith.constant 1.500000e+01 : f32
    %84 = vector.broadcast %cst_25 : f32 to vector<16x1xf32>
    %85 = arith.maximumf %84, %76 : vector<16x1xf32>
    %86 = vector.broadcast %cst_26 : f32 to vector<16x1xf32>
    %87 = arith.minimumf %86, %85 : vector<16x1xf32>
    %88 = vector.broadcast %87 : vector<16x1xf32> to vector<16x16xf32>
    %89 = vector.broadcast %35 : vector<1x16xf32> to vector<16x16xf32>
    %90 = arith.subf %88, %89 : vector<16x16xf32>
    %91 = math.absf %90 : vector<16x16xf32>
    %cst_27 = arith.constant 1.000000e+00 : f32
    %92 = vector.broadcast %cst_27 : f32 to vector<16x16xf32>
    %93 = arith.subf %92, %91 : vector<16x16xf32>
    %cst_28 = arith.constant 0.000000e+00 : f32
    %94 = vector.broadcast %cst_28 : f32 to vector<16x16xf32>
    %95 = arith.maximumf %94, %93 : vector<16x16xf32>
    %96 = vector.broadcast %83 : vector<16x1xf32> to vector<16x16xf32>
    %97 = arith.mulf %96, %95 : vector<16x16xf32>
    %98 = arith.addf %68, %97 : vector<16x16xf32>
    %cst_29 = arith.constant 0.000000e+00 : f32
    %99 = vector.broadcast %cst_29 : f32 to vector<16x16xf32>
    %cst_30 = arith.constant 2.000000e+00 : f32
    %100 = vector.broadcast %cst_30 : f32 to vector<16x1xf32>
    %101 = arith.mulf %33, %100 : vector<16x1xf32>
    %cst_31 = arith.constant 5.000000e-01 : f32
    %102 = vector.broadcast %cst_31 : f32 to vector<16x1xf32>
    %103 = arith.addf %101, %102 : vector<16x1xf32>
    %104 = vector.broadcast %25 : f32 to vector<16x1xf32>
    %105 = arith.mulf %103, %104 : vector<16x1xf32>
    %106 = vector.broadcast %9 : f32 to vector<16x1xf32>
    %107 = arith.addf %106, %105 : vector<16x1xf32>
    %cst_32 = arith.constant -1.000000e+00 : f32
    %108 = vector.broadcast %cst_32 : f32 to vector<16x1xf32>
    %109 = arith.cmpf oge, %107, %108 : vector<16x1xf32>
    %cst_33 = arith.constant 1.600000e+01 : f32
    %110 = vector.broadcast %cst_33 : f32 to vector<16x1xf32>
    %111 = arith.cmpf ole, %107, %110 : vector<16x1xf32>
    %112 = arith.andi %109, %111 : vector<16x1xi1>
    %113 = arith.extui %112 : vector<16x1xi1> to vector<16x1xi32>
    %114 = arith.sitofp %113 : vector<16x1xi32> to vector<16x1xf32>
    %cst_34 = arith.constant 0.000000e+00 : f32
    %cst_35 = arith.constant 1.500000e+01 : f32
    %115 = vector.broadcast %cst_34 : f32 to vector<16x1xf32>
    %116 = arith.maximumf %115, %107 : vector<16x1xf32>
    %117 = vector.broadcast %cst_35 : f32 to vector<16x1xf32>
    %118 = arith.minimumf %117, %116 : vector<16x1xf32>
    %119 = vector.broadcast %118 : vector<16x1xf32> to vector<16x16xf32>
    %120 = vector.broadcast %37 : vector<1x16xf32> to vector<16x16xf32>
    %121 = arith.subf %119, %120 : vector<16x16xf32>
    %122 = math.absf %121 : vector<16x16xf32>
    %cst_36 = arith.constant 1.000000e+00 : f32
    %123 = vector.broadcast %cst_36 : f32 to vector<16x16xf32>
    %124 = arith.subf %123, %122 : vector<16x16xf32>
    %cst_37 = arith.constant 0.000000e+00 : f32
    %125 = vector.broadcast %cst_37 : f32 to vector<16x16xf32>
    %126 = arith.maximumf %125, %124 : vector<16x16xf32>
    %127 = vector.broadcast %114 : vector<16x1xf32> to vector<16x16xf32>
    %128 = arith.mulf %127, %126 : vector<16x16xf32>
    %129 = arith.addf %99, %128 : vector<16x16xf32>
    %cst_38 = arith.constant 2.000000e+00 : f32
    %130 = vector.broadcast %cst_38 : f32 to vector<16x1xf32>
    %131 = arith.mulf %33, %130 : vector<16x1xf32>
    %cst_39 = arith.constant 1.500000e+00 : f32
    %132 = vector.broadcast %cst_39 : f32 to vector<16x1xf32>
    %133 = arith.addf %131, %132 : vector<16x1xf32>
    %134 = vector.broadcast %25 : f32 to vector<16x1xf32>
    %135 = arith.mulf %133, %134 : vector<16x1xf32>
    %136 = vector.broadcast %9 : f32 to vector<16x1xf32>
    %137 = arith.addf %136, %135 : vector<16x1xf32>
    %cst_40 = arith.constant -1.000000e+00 : f32
    %138 = vector.broadcast %cst_40 : f32 to vector<16x1xf32>
    %139 = arith.cmpf oge, %137, %138 : vector<16x1xf32>
    %cst_41 = arith.constant 1.600000e+01 : f32
    %140 = vector.broadcast %cst_41 : f32 to vector<16x1xf32>
    %141 = arith.cmpf ole, %137, %140 : vector<16x1xf32>
    %142 = arith.andi %139, %141 : vector<16x1xi1>
    %143 = arith.extui %142 : vector<16x1xi1> to vector<16x1xi32>
    %144 = arith.sitofp %143 : vector<16x1xi32> to vector<16x1xf32>
    %cst_42 = arith.constant 0.000000e+00 : f32
    %cst_43 = arith.constant 1.500000e+01 : f32
    %145 = vector.broadcast %cst_42 : f32 to vector<16x1xf32>
    %146 = arith.maximumf %145, %137 : vector<16x1xf32>
    %147 = vector.broadcast %cst_43 : f32 to vector<16x1xf32>
    %148 = arith.minimumf %147, %146 : vector<16x1xf32>
    %149 = vector.broadcast %148 : vector<16x1xf32> to vector<16x16xf32>
    %150 = vector.broadcast %37 : vector<1x16xf32> to vector<16x16xf32>
    %151 = arith.subf %149, %150 : vector<16x16xf32>
    %152 = math.absf %151 : vector<16x16xf32>
    %cst_44 = arith.constant 1.000000e+00 : f32
    %153 = vector.broadcast %cst_44 : f32 to vector<16x16xf32>
    %154 = arith.subf %153, %152 : vector<16x16xf32>
    %cst_45 = arith.constant 0.000000e+00 : f32
    %155 = vector.broadcast %cst_45 : f32 to vector<16x16xf32>
    %156 = arith.maximumf %155, %154 : vector<16x16xf32>
    %157 = vector.broadcast %144 : vector<16x1xf32> to vector<16x16xf32>
    %158 = arith.mulf %157, %156 : vector<16x16xf32>
    %159 = arith.addf %129, %158 : vector<16x16xf32>
    %c0 = arith.constant 0 : index
    %c0_46 = arith.constant 0 : index
    %160 = vector.load %arg4[%c0, %c0_46] : memref<16x256xf32, #tpu.memory_space<vmem>>, vector<16x256xf32>
    %cst_47 = arith.constant dense<0.000000e+00> : vector<16x256xf32>
    %161 = tpu.matmul %98, %160, %cst_47 {dimension_numbers = #tpu.dot_dimension_numbers<[1], [0], [0], [1], [0, 0, 1, 1], [], []>} : vector<16x16xf32>, vector<16x256xf32>, vector<16x256xf32> -> vector<16x256xf32>
    %c0_48 = arith.constant 0 : index
    %c0_49 = arith.constant 0 : index
    %162 = vector.load %arg5[%c0_48, %c0_49] : memref<16x256xf32, #tpu.memory_space<vmem>>, vector<16x256xf32>
    %cst_50 = arith.constant dense<0.000000e+00> : vector<16x256xf32>
    %163 = tpu.matmul %159, %162, %cst_50 {dimension_numbers = #tpu.dot_dimension_numbers<[1], [0], [0], [1], [0, 0, 1, 1], [], []>} : vector<16x16xf32>, vector<16x256xf32>, vector<16x256xf32> -> vector<16x256xf32>
    %164 = arith.mulf %161, %163 : vector<16x256xf32>
    %cst_51 = arith.constant 2.500000e-01 : f32
    %165 = vector.broadcast %cst_51 : f32 to vector<16x256xf32>
    %166 = arith.mulf %164, %165 : vector<16x256xf32>
    %c0_52 = arith.constant 0 : index
    %c0_53 = arith.constant 0 : index
    %c0_54 = arith.constant 0 : index
    %167 = vector.load %arg6[%c0_52, %c0_53, %c0_54] : memref<1x256x4xf32, #tpu.memory_space<vmem>>, vector<1x256x4xf32>
    %168 = vector.shape_cast %167 : vector<1x256x4xf32> to vector<256x4xf32>
    %cst_55 = arith.constant dense<0.000000e+00> : vector<16x4xf32>
    %169 = tpu.matmul %166, %168, %cst_55 {dimension_numbers = #tpu.dot_dimension_numbers<[1], [0], [0], [1], [0, 0, 1, 1], [], []>} : vector<16x256xf32>, vector<256x4xf32>, vector<16x4xf32> -> vector<16x4xf32>
    %c0_56 = arith.constant 0 : index
    %c0_57 = arith.constant 0 : index
    %c0_58 = arith.constant 0 : index
    %170 = vector.load %arg7[%c0_56, %c0_57, %c0_58] : memref<1x16x4xf32, #tpu.memory_space<vmem>>, vector<1x16x4xf32>
    %171 = vector.shape_cast %170 : vector<1x16x4xf32> to vector<16x4xf32>
    %172 = vector.shape_cast %169 : vector<16x4xf32> to vector<1x16x4xf32>
    tpu.vector_store %arg7[%c0_56, %c0_57, %c0_58], %172 {strides = array<i32>} : memref<1x16x4xf32, #tpu.memory_space<vmem>>, vector<1x16x4xf32>,
    return
  }
  func.func @transform_0(%arg0: i32, %arg1: i32, %arg2: memref<3xi32, #tpu.memory_space<smem>>) -> i32 {
    %c0_i32 = arith.constant 0 : i32
    %c0_i32_0 = arith.constant 0 : i32
    return %c0_i32 : i32
  }
  func.func @transform_1(%arg0: i32, %arg1: i32, %arg2: memref<3xi32, #tpu.memory_space<smem>>) -> (i32, i32) {
    %c0_i32 = arith.constant 0 : i32
    %c0_i32_0 = arith.constant 0 : i32
    %c0_i32_1 = arith.constant 0 : i32
    return %c0_i32, %c0_i32_0 : i32, i32
  }
  func.func @transform_2(%arg0: i32, %arg1: i32, %arg2: memref<3xi32, #tpu.memory_space<smem>>) -> (i32, i32) {
    %c0_i32 = arith.constant 0 : i32
    %c0_i32_0 = arith.constant 0 : i32
    %c0_i32_1 = arith.constant 0 : i32
    return %c0_i32, %c0_i32_0 : i32, i32
  }
  func.func @transform_3(%arg0: i32, %arg1: i32, %arg2: memref<3xi32, #tpu.memory_space<smem>>) -> (i32, i32, i32) {
    %0 = arith.index_cast %arg1 : i32 to index
    %1 = memref.load %arg2[%0] : memref<3xi32, #tpu.memory_space<smem>>
    %c0_i32 = arith.constant 0 : i32
    %c0_i32_0 = arith.constant 0 : i32
    return %1, %c0_i32, %arg0 : i32, i32, i32
  }
  func.func @transform_4(%arg0: i32, %arg1: i32, %arg2: memref<3xi32, #tpu.memory_space<smem>>) -> (i32, i32, i32) {
    %c0_i32 = arith.constant 0 : i32
    %c0_i32_0 = arith.constant 0 : i32
    return %arg1, %c0_i32, %arg0 : i32, i32, i32
  }
}

</mosaic_0001>

<bundles_post_ra>
// kernel: tpu_custom_call.1
= control target key start
LH: loop header
LB: loop body
LE: loop exit
PB: predicated region body
PF: predicated region fallthrough
CT: control target
= control target key end

     0   :  { %s1262_s0 = inlined_call_operand.vmem [shape: s32[3], index: 0, kind: input, shape index: {}]   ;;  %s1263_s1 = inlined_call_operand.vmem [shape: f32[12], index: 1, kind: input, shape index: {}]   ;;  %s1264_s2 = inlined_call_operand.vmem [shape: f32[16,256], index: 2, kind: input, shape index: {}]   ;;  %s1265_s3 = inlined_call_operand.vmem [shape: f32[16,256], index: 3, kind: input, shape index: {}]   ;;  %s1266_s4 = inlined_call_operand.vmem [shape: f32[2,256,4], index: 4, kind: input, shape index: {}]   ;;  %s1267_s5 = inlined_call_operand.vmem [shape: f32[3,16,4], index: 5, kind: output, shape index: {}]  }
   0x1   :  { %s10_s20 = sshll.u32 %s1262_s0, 4  ;;  %s11_s20 = int_to_ptr.vmem [resolvable:$true] %s10_s20 }
   0x2   :  { %s965_s21 = scalar_lea.vmem %s11_s20, 16  ;;  %p970_p1 = scmp.lt.s32.totalorder %s11_s20, %s11_s20 }
   0x3   :  { %p966_p0 = scmp.ne.s32.totalorder %s11_s20, %s965_s21  ;;  %p971_p2 = scmp.lt.s32.totalorder %s965_s21, %s965_s21 }
   0x5   :  { %p972_p3 = por %p971_p2, %p970_p1 }
   0x7   :  { %p973_p4 = pnand %p972_p3, %p966_p0 }
   0x9   :  { %976 = shalt.err (!%p973_p4)  }
   0xa   :  { %s1022_s22 = smov [#allocation3]  }
   0xb   :  { %13 = dma.vmem_to_smem %s11_s20, 16, %s1022_s22, [#allocation2] }
   0xc   :  { %1004 = dma.done.wait [#allocation2], 16 }
   0xd   :  { %1005 = vsyncadd [#allocation2], 4294967280 }
   0xe   :  { %15 = sfence }
   0xf   :  { %16 = vsyncpa [#allocation5], 0  ;;  %s1059_s23 = smov 0   ;;  %s1061_s24 = smov 0  }
  0x10   :  { %s1063_s25 = smov 0  }
  0x11 LB: > { %s821_s0 = sadd.s32 4294967295, %s1020_s25   ;;  %s31_s26 = sadd.s32 1, %s1016_s24  ;;  %s1020_s25 = sphi %s1063_s25, %s22_s25   ;;  %s1016_s24 = sphi %s1061_s24, %s1277_s24   ;;  %s1012_s23 = sphi %s1059_s23, %s1276_s23  }
  0x12   : > { %p32_p5 = scmp.ge.s32.totalorder %s31_s26, 3  ;;  %p823_p6 = scmp.ge.s32.totalorder %s1020_s25, 1 }
  0x13   : > { %p160_p7 = scmp.lt.s32.totalorder %s1020_s25, 4  ;;  %p1084_p9 = scmp.eq.s32.totalorder %s821_s0, 0 }
  0x14   : > { %s1279_s26 = smov (%p32_p5, %s31_s26), 0  ;;  %s173_s6 = sshll.u32 %s1263_s1, 4  ;;  %s174_s6 = int_to_ptr.vmem [resolvable:$true] %s173_s6 }
  0x15   : > { %p1080_p8 = pnand %p823_p6, %p160_p7  ;;  %s977_s7 = scalar_lea.vmem %s174_s6, 16 }
  0x16   : > { %p978_p12 = scmp.ne.s32.totalorder %s174_s6, %s977_s7  ;;  %p985_p2 = scmp.lt.s32.totalorder %s174_s6, %s174_s6 }
  0x17   : > { %p931_p10 = pneg %p1080_p8  ;;  %p986_p3 = scmp.lt.s32.totalorder %s977_s7, %s977_s7 }
  0x19   : > { %p932_p11 = pnand %p1084_p9, %p931_p10  ;;  %p987_p4 = por %p986_p3, %p985_p2 }
  0x1b   : > { %p979_p13 = pneg %p932_p11 }
  0x1d   : > { %p980_p0 = pnand %p979_p13, %p978_p12 }
  0x1f   : > { %p981_p1 = pneg %p980_p0 }
  0x21   : > { %p988_p5 = pnand %p987_p4, %p981_p1 }
  0x23   : > { %991 = shalt.err (!%p988_p5)
}
  0x24   : > { %s1023_s8 = smov [#allocation4]   ;;  %205 = sbr.rel (%p1080_p8) target bundleno = 535 (0x217), region = 36 }
  0x25   : > { %934 = dma.vmem_to_smem (!%p932_p11), %s174_s6, 16, %s1023_s8, [#allocation5]  }
  0x2b   : > { %1007 = dma.done.wait (%p1084_p9), [#allocation5], 16  }
  0x2c   : > { %1009 = vsyncadd (%p1084_p9), [#allocation5], 4294967280 }
  0x2d   : > { %211 = sfence }
  0x2e   : > { %v433_v0 = vld [vmem:[%s1264_s2 + $0x8] sm:$0xff]  ;;  %v435_v1 = vld [vmem:[%s1264_s2 + $0x18] sm:$0xff]  ;;  %v432_v2 = vld [vmem:[%s1264_s2] sm:$0xff]  ;;  %s832_s15 = sshll.u32 %s1012_s23, 2  ;;  %v279_v3 = vlaneseq  ;;  %v1024_v6 = vmov 0.0   ;;  %s1128_s12 = sld [smem:[#allocation3 + %s1012_s23]] }
  0x2f   : > { %v887_v4 = vpack.c.bf16 %v435_v1, %v433_v0  ;;  %v434_v5 = vld [vmem:[%s1264_s2 + $0x10] sm:$0xff]  ;;  %507 = vmatprep.mubr.f32.mxu1 %v1024_v6  ;;  %v521_v7 = vld [vmem:[%s1265_s3 + $0x8] sm:$0xff]  ;;  %v523_v8 = vld [vmem:[%s1265_s3 + $0x18] sm:$0xff]  ;;  %s1121_s22 = sld [smem:[#allocation4 + %s832_s15]]  ;;  %s260_s0 = sadd.s32 1, %s832_s15  ;;  %vm436_vm13 = vcmask 130048  }
  0x30   : > { %v889_v9 = vpack.c.bf16 %v434_v5, %v432_v2  ;;  %v891_v10 = vpack.c.bf16 %v523_v8, %v521_v7  ;;  %s1123_s27 = sld [smem:[#allocation4 + %s260_s0]]  ;;  %s263_s28 = sadd.s32 2, %s832_s15  ;;  %v280_v11 = vshrl.u32 %v279_v3, 7  ;;  %v294_v29 = vand.u32 127, %v279_v3 }
  0x31   : > { %888 = vmatprep.subr.bf16.mxu1 %v887_v4  ;;  %s264_s29 = sld [smem:[#allocation4 + %s263_s28]]  ;;  %s266_s30 = sadd.s32 3, %s832_s15 }
  0x32   : > { %890 = vmatpush1.bf16.msra.mxu1 %v889_v9  ;;  %s267_s6 = sld [smem:[#allocation4 + %s266_s30]]  ;;  %v282_v12 = vcvt.s32.f32 %v280_v11  ;;  %v281_v13 = vadd.s32 8, %v280_v11  ;;  %s1025_s14 = smov 1.0   ;;  %v1137_v46 = vcvt.s32.f32 %v294_v29 }
  0x33   : > { %892 = vmatprep.subr.bf16.mxu1 %v891_v10  ;;  %p249_p7 = scmp.lt.s32.totalorder %s1012_s23, 2 }
  0x34   : > { %v285_v14 = vmul.f32 0.25, %v282_v12  ;;  %v283_v15 = vcvt.s32.f32 %v281_v13  ;;  %p240_p6 = scmp.lt.s32.totalorder %s1128_s12, 1 }
  0x35   : > { %s259_s7 = smul.f32 0.5, %s1121_s22  ;;  %s1283_s23 = smov (!%p249_p7, %s1012_s23), 2 }
  0x36   : > { %s262_s8 = smul.f32 0.5, %s1123_s27  ;;  %v287_v16 = vfloor.f32 %v285_v14  ;;  %v286_v17 = vmul.f32 0.25, %v283_v15  ;;  %s1281_s12 = smov (!%p240_p6, %s1128_s12), 1 }
  0x37   : > { %s265_s9 = smul.f32 0.5, %s264_s29  ;;  %v303_v30 = vstv %s259_s7  ;;  %s847_s19 = sshll.u32 %s1281_s12, 8 }
  0x38   : > { %s268_s10 = smul.f32 0.5, %s267_s6  ;;  %v289_v18 = vmul.f32 4.0, %v287_v16  ;;  %v296_v19 = vmul.f32 2.0, %v287_v16  ;;  %v288_v20 = vfloor.f32 %v286_v17  ;;  %v1130_v31 = vstv %s262_s8  ;;  %s1165_s22 = scalar_lea.vmem %s1266_s4, %s847_s19  ;;  %v520_v17 = vld [vmem:[%s1265_s3] sm:$0xff] }
  0x39   : > { %s269_s11 = ssub.f32 %s265_s9, %s259_s7  ;;  %s848_s30 = sshll.u32 %s1283_s23, 4 }
  0x3a   : > { %s271_s13 = ssub.f32 %s268_s10, %s262_s8  ;;  %v291_v21 = vsub.f32 %v282_v12, %v289_v18  ;;  %v297_v22 = vmul.f32 2.0, %v288_v20  ;;  %v298_v23 = vadd.f32 0.5, %v296_v19  ;;  %v332_v24 = vadd.f32 1.5, %v296_v19  ;;  %v522_v18 = vld [vmem:[%s1265_s3 + $0x10] sm:$0xff]  ;;  %s256_s8 = scalar_lea.vmem %s1267_s5, %s848_s30 }
  0x3b   : > { %s270_s15 = smax.f32 %s1025_s14, %s269_s11  ;;  %v290_v25 = vmul.f32 4.0, %v288_v20  ;;  %v621_v20 = vld [vmem:[%s1165_s22 + $0x30] sm:$0xff] }
  0x3c   : > { %s272_s16 = smax.f32 %s1025_s14, %s271_s13  ;;  %s275_s17 = smul.f32 0.125, %s270_s15  ;;  %v364_v26 = vmul.f32 2.0, %v291_v21  ;;  %v299_v27 = vadd.f32 0.5, %v297_v22  ;;  %v333_v28 = vadd.f32 1.5, %v297_v22 }
  0x3d   : > { %s278_s18 = smul.f32 0.125, %s272_s16  ;;  %v292_v35 = vsub.f32 %v283_v15, %v290_v25 }
  0x3e   : > { %v300_v32 = vstv %s275_s17  ;;  %v366_v33 = vadd.f32 0.5, %v364_v26  ;;  %v400_v34 = vadd.f32 1.5, %v364_v26 }
  0x3f   : > { %v301_v36 = vmul.f32 %v300_v32, %v298_v23  ;;  %v334_v37 = vmul.f32 %v332_v24, %v300_v32  ;;  %v1132_v38 = vstv %s278_s18  ;;  %v302_v39 = vmul.f32 %v300_v32, %v299_v27 }
  0x40   : > { %v335_v40 = vmul.f32 %v333_v28, %v300_v32  ;;  %v369_v41 = vmul.f32 %v1132_v38, %v366_v33  ;;  %v402_v45 = vmul.f32 %v400_v34, %v1132_v38  ;;  %v365_v49 = vmul.f32 2.0, %v292_v35  ;;  %v631_v33 = vld [vmem:[%s1165_s22 + $0x80] sm:$0xff] }
  0x41   : > { %v304_v42 = vadd.f32 %v303_v30, %v301_v36  ;;  %v336_v43 = vadd.f32 %v334_v37, %v303_v30  ;;  %v305_v44 = vadd.f32 %v303_v30, %v302_v39  ;;  %v893_v35 = vpack.c.bf16 %v522_v18, %v520_v17  ;;  %v632_v39 = vld [vmem:[%s1165_s22 + $0x88] sm:$0xff] }
  0x42   : > { %v337_v47 = vadd.f32 %v335_v40, %v303_v30  ;;  %v372_v48 = vadd.f32 %v1130_v31, %v369_v41  ;;  %v404_v55 = vadd.f32 %v402_v45, %v1130_v31  ;;  %v367_v58 = vadd.f32 0.5, %v365_v49  ;;  %v615_v40 = vld [vmem:[%s1165_s22] sm:$0xff]  ;;  %v616_v41 = vld [vmem:[%s1165_s22 + $0x8] sm:$0xff] }
  0x43   : > { %vm306_vm0 = vcmp.ge.f32.partialorder %v304_v42, -1.0  ;;  %vm308_vm1 = vcmp.le.f32.partialorder %v304_v42, 16.0  ;;  %v316_v50 = vmax.f32 %v304_v42, 0.0  ;;  %vm338_vm2 = vcmp.ge.f32.partialorder %v336_v43, -1.0 }
  0x44   : > { %vm1140_vm3 = vmand %vm306_vm0, %vm308_vm1  ;;  %vm340_vm4 = vcmp.le.f32.partialorder %v336_v43, 16.0  ;;  %v348_v52 = vmax.f32 %v336_v43, 0.0  ;;  %vm307_vm5 = vcmp.ge.f32.partialorder %v305_v44, -1.0  ;;  %vm309_vm6 = vcmp.le.f32.partialorder %v305_v44, 16.0 }
  0x45   : > { %v318_v53 = vmin.f32 %v316_v50, 15.0  ;;  %vm342_vm7 = vmand %vm338_vm2, %vm340_vm4  ;;  %v317_v54 = vmax.f32 %v305_v44, 0.0  ;;  %vm339_vm8 = vcmp.ge.f32.partialorder %v337_v47, -1.0  ;;  %vm341_vm10 = vcmp.le.f32.partialorder %v337_v47, 16.0 }
  0x46   : > { %v350_v56 = vmin.f32 %v348_v52, 15.0  ;;  %vm311_vm9 = vmand %vm307_vm5, %vm309_vm6  ;;  %v349_v57 = vmax.f32 %v337_v47, 0.0  ;;  %v833_v59 = vsel %vm1140_vm3, 1.0, %v1024_v6  ;;  %v835_v61 = vsel %vm342_vm7, 1.0, %v1024_v6  ;;  %v633_v47 = vld [vmem:[%s1165_s22 + $0x90] sm:$0xff] }
  0x47   : > { %v320_v60 = vsub.f32 %v318_v53, %v1137_v46  ;;  %v319_v62 = vmin.f32 %v317_v54, 15.0  ;;  %vm343_vm11 = vmand %vm339_vm8, %vm341_vm10  ;;  %v834_v0 = vsel %vm311_vm9, 1.0, %v1024_v6  ;;  %vm374_vm12 = vcmp.ge.f32.partialorder %v372_v48, -1.0 }
  0x48   : > { %v352_v63 = vsub.f32 %v350_v56, %v1137_v46  ;;  %v351_v1 = vmin.f32 %v349_v57, 15.0  ;;  %v836_v4 = vsel %vm343_vm11, 1.0, %v1024_v6  ;;  %v384_v5 = vmax.f32 %v372_v48, 0.0 }
  0x49   : > { %v322_v2 = vand.u32 2147483647, %v320_v60  ;;  %v321_v3 = vsub.f32 %v319_v62, %v1137_v46  ;;  %vm376_vm14 = vcmp.le.f32.partialorder %v372_v48, 16.0  ;;  %vm406_vm15 = vcmp.ge.f32.partialorder %v404_v55, -1.0  ;;  %v634_v48 = vld [vmem:[%s1165_s22 + $0x98] sm:$0xff] }
  0x4a   : > { %v354_v7 = vand.u32 2147483647, %v352_v63  ;;  %v353_v8 = vsub.f32 %v351_v1, %v1137_v46  ;;  %v386_v11 = vmin.f32 %v384_v5, 15.0  ;;  %v416_v12 = vmax.f32 %v404_v55, 0.0  ;;  %vm1175_vm1 = vmand %vm374_vm12, %vm376_vm14  ;;  %v618_v62 = vld [vmem:[%s1165_s22 + $0x18] sm:$0xff]  ;;  %v635_v1 = vld [vmem:[%s1165_s22 + $0xa0] sm:$0xff] }
  0x4b   : > { %v324_v9 = vsub.f32 1.0, %v322_v2  ;;  %v323_v10 = vand.u32 2147483647, %v321_v3  ;;  %vm408_vm0 = vcmp.le.f32.partialorder %v404_v55, 16.0  ;;  %v370_v15 = vmul.f32 %v1132_v38, %v367_v58  ;;  %v636_v2 = vld [vmem:[%s1165_s22 + $0xa8] sm:$0xff] }
  0x4c   : > { %v356_v13 = vsub.f32 1.0, %v354_v7  ;;  %v355_v14 = vand.u32 2147483647, %v353_v8  ;;  %v388_v21 = vsub.f32 %v386_v11, %v1137_v46  ;;  %v418_v22 = vmin.f32 %v416_v12, 15.0  ;;  %vm1185_vm2 = vmand %vm406_vm15, %vm408_vm0 }
  0x4d   : > { %v326_v16 = vmax.f32 %v324_v9, 0.0  ;;  %v325_v19 = vsub.f32 1.0, %v323_v10  ;;  %v1181_v25 = vadd.f32 %v1130_v31, %v370_v15  ;;  %v401_v26 = vadd.f32 1.5, %v365_v49  ;;  %v619_v9 = vld [vmem:[%s1165_s22 + $0x20] sm:$0xff]  ;;  %v620_v10 = vld [vmem:[%s1165_s22 + $0x28] sm:$0xff] }
  0x4e   : > { %v358_v23 = vmax.f32 %v356_v13, 0.0  ;;  %v357_v24 = vsub.f32 1.0, %v355_v14  ;;  %v390_v29 = vand.u32 2147483647, %v388_v21  ;;  %v420_v32 = vsub.f32 %v418_v22, %v1137_v46  ;;  %v637_v13 = vld [vmem:[%s1165_s22 + $0xb0] sm:$0xff]  ;;  %v638_v14 = vld [vmem:[%s1165_s22 + $0xb8] sm:$0xff] }
  0x4f   : > { %v328_v27 = vmul.f32 %v833_v59, %v326_v16  ;;  %v327_v28 = vmax.f32 %v325_v19, 0.0  ;;  %v837_v37 = vsel %vm1175_vm1, 1.0, %v1024_v6  ;;  %v385_v45 = vmax.f32 %v1181_v25, 0.0  ;;  %v622_v21 = vld [vmem:[%s1165_s22 + $0x38] sm:$0xff] }
  0x50   : > { %v360_v34 = vmul.f32 %v835_v61, %v358_v23  ;;  %v359_v36 = vmax.f32 %v357_v24, 0.0  ;;  %v392_v43 = vsub.f32 1.0, %v390_v29  ;;  %v422_v44 = vand.u32 2147483647, %v420_v32  ;;  %v617_v61 = vld [vmem:[%s1165_s22 + $0x10] sm:$0xff]  ;;  %v639_v23 = vld [vmem:[%s1165_s22 + $0xc0] sm:$0xff] }
  0x51   : > { %v329_v42 = vmul.f32 %v834_v0, %v327_v28  ;;  %v839_v51 = vsel %vm1185_vm2, 1.0, %v1024_v6  ;;  %v403_v52 = vmul.f32 %v401_v26, %v1132_v38  ;;  %v387_v55 = vmin.f32 %v385_v45, 15.0  ;;  %v640_v24 = vld [vmem:[%s1165_s22 + $0xc8] sm:$0xff]  ;;  %v627_v45 = vld [vmem:[%s1165_s22 + $0x60] sm:$0xff] }
  0x52   : > { %v362_v49 = vadd.f32 %v360_v34, %v328_v27  ;;  %v361_v50 = vmul.f32 %v836_v4, %v359_v36  ;;  %v394_v53 = vmax.f32 %v392_v43, 0.0  ;;  %v424_v54 = vsub.f32 1.0, %v422_v44  ;;  %v642_v36 = vld [vmem:[%s1165_s22 + $0xd8] sm:$0xff]  ;;  %v644_v43 = vld [vmem:[%s1165_s22 + $0xe8] sm:$0xff] }
  0x53   : > { %v895_v56 = vpack.c.bf16 %v632_v39, %v631_v33  ;;  %v405_v58 = vadd.f32 %v403_v52, %v1130_v31  ;;  %v897_v59 = vpack.c.bf16 %v616_v41, %v615_v40  ;;  %v899_v60 = vpack.c.bf16 %v634_v48, %v633_v47  ;;  %v623_v33 = vld [vmem:[%s1165_s22 + $0x40] sm:$0xff]  ;;  %v625_v39 = vld [vmem:[%s1165_s22 + $0x50] sm:$0xff]  ;;  %v626_v40 = vld [vmem:[%s1165_s22 + $0x58] sm:$0xff] }
  0x54   : > { %841 = vmatmul.mubr.msk.f32.vlgmr.msra.gmra.mrb[0].mxu1 %vm436_vm13, %v362_v49  ;;  %v363_v57 = vadd.f32 %v361_v50, %v329_v42  ;;  %v396_v63 = vmul.f32 %v837_v37, %v394_v53  ;;  %v426_v38 = vmax.f32 %v424_v54, 0.0  ;;  %v389_v0 = vsub.f32 %v387_v55, %v1137_v46  ;;  %v643_v42 = vld [vmem:[%s1165_s22 + $0xe0] sm:$0xff]  ;;  %v628_v47 = vld [vmem:[%s1165_s22 + $0x68] sm:$0xff]  ;;  %v645_v48 = vld [vmem:[%s1165_s22 + $0xf0] sm:$0xff] }
  0x55   : > { %894 = vmatpush1.bf16.msra.mxu1 %v893_v35  ;;  %513 = vmatprep.mubr.f32.mxu1 %v1024_v6  ;;  %vm375_vm3 = vcmp.ge.f32.partialorder %v1181_v25, -1.0  ;;  %v417_v3 = vmax.f32 %v405_v58, 0.0  ;;  %vm377_vm4 = vcmp.le.f32.partialorder %v1181_v25, 16.0  ;;  %v901_v5 = vpack.c.bf16 %v618_v62, %v617_v61  ;;  %v641_v35 = vld [vmem:[%s1165_s22 + $0xd0] sm:$0xff]  ;;  %v646_v50 = vld [vmem:[%s1165_s22 + $0xf8] sm:$0xff] }
  0x56   : > { %896 = vmatprep.subr.bf16.mxu0 %v895_v56  ;;  %v428_v31 = vmul.f32 %v839_v51, %v426_v38  ;;  %v391_v4 = vand.u32 2147483647, %v389_v0  ;;  %v903_v8 = vpack.c.bf16 %v636_v2, %v635_v1  ;;  %vm407_vm5 = vcmp.ge.f32.partialorder %v405_v58, -1.0  ;;  %vm379_vm7 = vmand %vm375_vm3, %vm377_vm4  ;;  %v629_v52 = vld [vmem:[%s1165_s22 + $0x70] sm:$0xff]  ;;  %v630_v53 = vld [vmem:[%s1165_s22 + $0x78] sm:$0xff] }
  0x57   : > { %898 = vmatpush3.bf16.msra.mxu0 %v897_v59  ;;  %v419_v7 = vmin.f32 %v417_v3, 15.0  ;;  %vm409_vm6 = vcmp.le.f32.partialorder %v405_v58, 16.0  ;;  %v905_v16 = vpack.c.bf16 %v620_v10, %v619_v9  ;;  %v907_v19 = vpack.c.bf16 %v638_v14, %v637_v13 }
  0x58   : > { %842 = vmatmul.mubr.msk.f32.gmra.mrb[2].mxu1 %vm436_vm13, %v363_v57  ;;  %900 = vmatprep.subr.bf16.mxu0 %v899_v60  ;;  %v430_v11 = vadd.f32 %v428_v31, %v396_v63  ;;  %v393_v12 = vsub.f32 1.0, %v391_v4  ;;  %vm411_vm8 = vmand %vm407_vm5, %vm409_vm6  ;;  %v838_v22 = vsel %vm379_vm7, 1.0, %v1024_v6  ;;  %v909_v26 = vpack.c.bf16 %v622_v21, %v621_v20 }
  0x59   : > { %594 = vmatprep.mubr.f32.mxu1 %v1024_v6  ;;  %v421_v15 = vsub.f32 %v419_v7, %v1137_v46  ;;  %v840_v25 = vsel %vm411_vm8, 1.0, %v1024_v6  ;;  %v911_v29 = vpack.c.bf16 %v640_v24, %v639_v23  ;;  %v915_v37 = vpack.c.bf16 %v642_v36, %v641_v35 }
  0x5a   : > { %v395_v17 = vmax.f32 %v393_v12, 0.0  ;;  %v917_v41 = vpack.c.bf16 %v626_v40, %v625_v39  ;;  %v919_v44 = vpack.c.bf16 %v644_v43, %v643_v42  ;;  %v921_v49 = vpack.c.bf16 %v628_v47, %v627_v45 }
  0x5b   : > { %902 = vmatpush3.bf16.msra.mxu0 %v901_v5  ;;  %v423_v18 = vand.u32 2147483647, %v421_v15  ;;  %v923_v51 = vpack.c.bf16 %v646_v50, %v645_v48  ;;  %v925_v54 = vpack.c.bf16 %v630_v53, %v629_v52  ;;  %vm722_vm9 = vcmask 31744  }
  0x5c   : > { %843 = vmatmul.mubr.msk.f32.vlgmr.msra.gmra.mrb[4].mxu1 %vm436_vm13, %v430_v11  ;;  %904 = vmatprep.subr.bf16.mxu0 %v903_v8  ;;  %v397_v27 = vmul.f32 %v838_v22, %v395_v17 }
  0x5d   : > { %600 = vmatprep.mubr.f32.mxu1 %v1024_v6  ;;  %v425_v46 = vsub.f32 1.0, %v423_v18  ;;  %v624_v6 = vld [vmem:[%s1165_s22 + $0x48] sm:$0xff] }
  0x5e   : > { %v913_v34 = vpack.c.bf16 %v624_v6, %v623_v33 }
  0x5f   : > { %906 = vmatpush3.bf16.msra.mxu0 %v905_v16  ;;  %v427_v28 = vmax.f32 %v425_v46, 0.0 }
  0x60   : > { %908 = vmatprep.subr.bf16.mxu0 %v907_v19 }
  0x61   : > { %v429_v30 = vmul.f32 %v840_v25, %v427_v28 }
  0x63   : > { %910 = vmatpush3.bf16.msra.mxu0 %v909_v26  ;;  %v431_v32 = vadd.f32 %v429_v30, %v397_v27 }
  0x64   : > { %912 = vmatprep.subr.bf16.mxu0 %v911_v29 }
  0x65   : > { %844 = vmatmul.mubr.msk.f32.gmra.mrb[6].mxu1 %vm436_vm13, %v431_v32 }
  0x67   : > { %914 = vmatpush3.bf16.msra.mxu0 %v913_v34 }
  0x68   : > { %916 = vmatprep.subr.bf16.mxu0 %v915_v37 }
  0x6b   : > { %918 = vmatpush3.bf16.msra.mxu0 %v917_v41 }
  0x6c   : > { %920 = vmatprep.subr.bf16.mxu0 %v919_v44 }
  0x6f   : > { %922 = vmatpush3.bf16.msra.mxu0 %v921_v49 }
  0x70   : > { %924 = vmatprep.subr.bf16.mxu0 %v923_v51 }
  0x73   : > { %926 = vmatpush3.bf16.msra.mxu0 %v925_v54 }
 0x127   : > { %v509_v55 = vpop.f32.mrb[0].mxu1 }
 0x128   : > { %v511_v56 = vpop.f32.mrb[1].mxu1 }
 0x12b   : > { %v515_v57 = vpop.f32.mrb[2].mxu1 }
 0x12c   : > { %v517_v58 = vpop.f32.mrb[3].mxu1 }
 0x12f   : > { %v596_v59 = vpop.f32.mrb[4].mxu1 }
 0x130   : > { %v607_v60 = vmul.f32 %v596_v59, %v509_v55  ;;  %v598_v61 = vpop.f32.mrb[5].mxu1 }
 0x131   : > { %v608_v62 = vmul.f32 %v598_v61, %v511_v56 }
 0x132   : > { %v611_v38 = vmul.f32 0.25, %v607_v60 }
 0x133   : > { %v612_v63 = vmul.f32 0.25, %v608_v62 }
 0x135   : > { %711 = vmatprep.mubr.f32.mxu0 %v612_v63 }
 0x136   : > { %712 = vmatmul.mubr.f32.vlgmr.msra.gmra.mrb[0].mxu0 %v611_v38 }
 0x138   : > { %v602_v0 = vpop.f32.mrb[6].mxu1 }
 0x139   : > { %v609_v1 = vmul.f32 %v602_v0, %v515_v57  ;;  %v604_v2 = vpop.f32.mrb[7].mxu1 }
 0x13a   : > { %v610_v3 = vmul.f32 %v604_v2, %v517_v58 }
 0x13b   : > { %v613_v4 = vmul.f32 0.25, %v609_v1 }
 0x13c   : > { %v614_v31 = vmul.f32 0.25, %v610_v3 }
 0x13e   : > { %716 = vmatprep.mubr.f32.mxu0 %v614_v31 }
 0x13f   : > { %717 = vmatmul.mubr.f32.gmra.mrb[2].mxu0 %v613_v4 }
 0x209   : > { %v881_v5 = vpop.f32.mrb[0].mxu0 }
 0x20a   : > { %v882_v7 = vpop.f32.mrb[1].mxu0 }
 0x20b   : > { %v883_v8 = vadd.f32 %v882_v7, %v881_v5 }
 0x20d   : > { %723 = vst.msk [vmem:[%s256_s8] sm:$0xff] %vm722_vm9, %v883_v8 }
 0x212   : > { %v884_v9 = vpop.f32.mrb[2].mxu0 }
 0x213   : > { %v885_v10 = vpop.f32.mrb[3].mxu0 }
 0x214   : > { %v886_v11 = vadd.f32 %v885_v10, %v884_v9 }
 0x216   : > { %724 = vst.msk [vmem:[%s256_s8 + $0x8] sm:$0xff] %vm722_vm9, %v886_v11 }
 0x217 PF: > { %s22_s25 = sadd.s32 1, %s1020_s25   ;;  %s1276_s23 = smov %s1016_s24 }
 0x218   : > { %p19_p8 = scmp.ge.s32.totalorder %s22_s25, 5   ;;  %s1277_s24 = smov %s1279_s26 }
 0x21a   :  { %21 = sbr.rel (!%p19_p8) target bundleno = 17 (0x11), region = 71 }
 0x221   :  { %752 = vsyncpa [#allocation5], 1 }
 0x222   :  { %754 = vsyncpa [#allocation5 + $0x1], 1 }

</bundles_post_ra>
